<compile_context>
chip_gen: v7x
topology: tpu7x:2x2x1
jax: 0.10.0
libtpu: 0.0.40
codegen_flags: <defaults>
</compile_context>

<pallas_src>
import functools

import jax
import jax.numpy as jnp
from jax.experimental import pallas as pl
from jax.experimental.pallas import tpu as pltpu
from jax.scipy.linalg import block_diag


# --------------------------------------------------------------------------- #
# Kernel
# --------------------------------------------------------------------------- #
def _state_encoder_kernel(xz_ref, blob_ref, out_ref, *,
                          num_encoders, enc_out_dim, ctx_dim,
                          r_w2, r_w3, r_b, r_e, r_s):
    K = num_encoders
    kxo = K * enc_out_dim
    cols = blob_ref.shape[-1]          # fused hidden width (K*h + h_trunk)
    xz_dim = xz_ref.shape[-1]          # ctx_dim + state_dim + num_tasks
    cdt = blob_ref.dtype               # MXU operand dtype (f32 or bf16)

    xz = xz_ref[...]                   # (TB, xz_dim) f32
    x_c = xz.astype(cdt)

    # Carve the packed weight blob with static, sublane-aligned slices.
    w1 = blob_ref[0:xz_dim, :]                     # (xz_dim, cols)
    w2 = blob_ref[r_w2:r_w2 + cols, :]             # (cols, cols)
    w3 = blob_ref[r_w3:r_w3 + cols, :]             # (cols, cols)
    bias = blob_ref[r_b:r_b + 8, :].astype(jnp.float32)
    b1, b2, b3 = bias[0:1, :], bias[1:2, :], bias[2:3, :]

    # --- fused trunk + mixture-encoder MLP: 3 block-diagonal matmuls --------
    h = jnp.dot(x_c, w1, preferred_element_type=jnp.float32) + b1
    h = jnp.maximum(h, 0.0)
    h = jnp.dot(h.astype(cdt), w2, preferred_element_type=jnp.float32) + b2
    h = jnp.maximum(h, 0.0)
    o3 = jnp.dot(h.astype(cdt), w3, preferred_element_type=jnp.float32) + b3

    z_all = o3[:, 0:kxo]               # (TB, K*out)  all encoder outputs
    logits = o3[:, kxo:kxo + K]        # (TB, K)      trunk logits

    # --- softmax attention weights (f32 elementwise) ------------------------
    m = jnp.max(logits, axis=-1, keepdims=True)
    e = jnp.exp(logits - m)
    alpha = e / jnp.sum(e, axis=-1, keepdims=True)
    # (reference also divides z_enc by alpha.sum(-1); that sum is the softmax
    #  normalizer == 1, so the divide is skipped.)

    # --- attention-weighted sum over encoders, matmul form (MXU) ------------
    e_mat = blob_ref[r_e:r_e + K, 0:kxo]            # (K, K*out) 0/1 expansion
    s_mat = blob_ref[r_s:r_s + kxo, 0:enc_out_dim]  # (K*out, out) stacked identity
    alpha_exp = jnp.dot(alpha.astype(cdt), e_mat,
                        preferred_element_type=jnp.float32)   # (TB, K*out)
    weighted = (alpha_exp * z_all).astype(cdt)
    z_enc = jnp.dot(weighted, s_mat, preferred_element_type=jnp.float32)

    # --- concat([z_context, z_enc]) via two static slice stores -------------
    out_ref[:, 0:ctx_dim] = xz[:, 0:ctx_dim].astype(out_ref.dtype)
    out_ref[:, ctx_dim:] = z_enc.astype(out_ref.dtype)


# --------------------------------------------------------------------------- #
# One-time weight packing (outside the hot path)
# --------------------------------------------------------------------------- #
def _pad_rows(a, mult=16):
    pad = (-a.shape[0]) % mult
    return jnp.pad(a, ((0, pad), (0, 0))) if pad else a


def pack_params(params, *, num_tasks, compute_dtype=jnp.float32):
    """Pack all weights/biases + helper matrices into one flat 2-D blob."""
    W1, b1, W2, b2, W3, b3 = (params[n] for n in ("W1", "b1", "W2", "b2", "W3", "b3"))
    Wt1, bt1, Wt2, bt2, Wt3, bt3 = (params[n] for n in
                                    ("Wt1", "bt1", "Wt2", "bt2", "Wt3", "bt3"))
    K, state_dim, h1 = W1.shape
    h2 = W2.shape[2]
    out_dim = W3.shape[2]
    ctx_dim, th1 = Wt1.shape
    th2 = Wt2.shape[1]

    kh1, kh2, ko = K * h1, K * h2, K * out_dim
    cols = max(kh1 + th1, kh2 + th2, ko + K)
    xz_dim = ctx_dim + state_dim + num_tasks            # kernel input = [z | s | 1hot]
    f32 = jnp.float32

    # layer-1 fused weight; one-hot rows stay zero (folds the mtobss split away)
    W1f = jnp.zeros((xz_dim, cols), f32)
    W1f = W1f.at[ctx_dim:ctx_dim + state_dim, 0:kh1].set(
        jnp.transpose(W1, (1, 0, 2)).reshape(state_dim, kh1))
    W1f = W1f.at[0:ctx_dim, kh1:kh1 + th1].set(Wt1)
    W1f = _pad_rows(W1f)

    W2f = jnp.zeros((cols, cols), f32)
    W2f = W2f.at[0:kh1, 0:kh2].set(block_diag(*[W2[k] for k in range(K)]))
    W2f = W2f.at[kh1:kh1 + th1, kh2:kh2 + th2].set(Wt2)

    W3f = jnp.zeros((cols, cols), f32)
    W3f = W3f.at[0:kh2, 0:ko].set(block_diag(*[W3[k] for k in range(K)]))
    W3f = W3f.at[kh2:kh2 + th2, ko:ko + K].set(Wt3)

    Bf = jnp.zeros((8, cols), f32)
    Bf = Bf.at[0, 0:kh1].set(b1.reshape(kh1)).at[0, kh1:kh1 + th1].set(bt1.reshape(th1))
    Bf = Bf.at[1, 0:kh2].set(b2.reshape(kh2)).at[1, kh2:kh2 + th2].set(bt2.reshape(th2))
    Bf = Bf.at[2, 0:ko].set(b3.reshape(ko)).at[2, ko:ko + K].set(bt3.reshape(K))
    Bf = _pad_rows(Bf)

    Ef = jnp.zeros((K, cols), f32)                        # alpha lane expansion
    for k in range(K):
        Ef = Ef.at[k, k * out_dim:(k + 1) * out_dim].set(1.0)
    Ef = _pad_rows(Ef)

    Sf = jnp.zeros((ko, cols), f32)                       # stacked-identity reducer
    eye = jnp.eye(out_dim, dtype=f32)
    for k in range(K):
        Sf = Sf.at[k * out_dim:(k + 1) * out_dim, 0:out_dim].set(eye)
    Sf = _pad_rows(Sf)

    r_w2 = W1f.shape[0]
    r_w3 = r_w2 + cols
    r_b = r_w3 + cols
    r_e = r_b + Bf.shape[0]
    r_s = r_e + Ef.shape[0]

    blob = jnp.concatenate([W1f, W2f, W3f, Bf, Ef, Sf], axis=0).astype(compute_dtype)
    meta = dict(num_encoders=K, enc_out_dim=out_dim, ctx_dim=ctx_dim,
                r_w2=r_w2, r_w3=r_w3, r_b=r_b, r_e=r_e, r_s=r_s)
    return {"blob": blob, "meta": meta}


# --------------------------------------------------------------------------- #
# Wrapper
# --------------------------------------------------------------------------- #
def state_encoder_forward(z_context, mtobss, blob, *, meta, block_b=256):
    """Fused forward pass. blob: packed weights (f32 or bf16); meta: static ints."""
    # taskIndices = argmax(one_hots) is computed by the torch module but unused
    # by forward(); detach_z_encs only affects gradients -> both skipped.
    xz = jnp.concatenate([z_context, mtobss], axis=1).astype(jnp.float32)
    B, xz_dim = xz.shape

    # batch tiling: pad to a multiple of the batch tile (multiple of 8 sublanes)
    Bp = -(-B // 8) * 8
    tb = min(block_b, Bp)
    Bp = -(-Bp // tb) * tb
    if Bp != B:
        xz = jnp.pad(xz, ((0, Bp - B), (0, 0)))

    out_w = meta["ctx_dim"] + meta["enc_out_dim"]
    kernel = functools.partial(
        _state_encoder_kernel,
        num_encoders=meta["num_encoders"], enc_out_dim=meta["enc_out_dim"],
        ctx_dim=meta["ctx_dim"], r_w2=meta["r_w2"], r_w3=meta["r_w3"],
        r_b=meta["r_b"], r_e=meta["r_e"], r_s=meta["r_s"])

    out = pl.pallas_call(
        kernel,
        out_shape=jax.ShapeDtypeStruct((Bp, out_w), jnp.float32),
        grid_spec=pltpu.PrefetchScalarGridSpec(
            num_scalar_prefetch=0,
            grid=(Bp // tb,),
            in_specs=[
                pl.BlockSpec((tb, xz_dim), lambda i: (i, 0)),          # activations
                pl.BlockSpec(blob.shape, lambda i: (0, 0)),            # weights: VMEM-resident
            ],
            out_specs=pl.BlockSpec((tb, out_w), lambda i: (i, 0)),
        ),
        compiler_params=pltpu.CompilerParams(
            dimension_semantics=("parallel",)),                         # v7x: shard over 2 TCs
    )(xz, blob)
    return out[:B] if Bp != B else out


# --------------------------------------------------------------------------- #
# Pure-JAX reference (mirrors the PyTorch forward, unpacked weights)
# --------------------------------------------------------------------------- #
def state_encoder_reference(z_context, mtobss, params, *, num_tasks):
    states = mtobss[:, :-num_tasks]
    h = jnp.einsum("kio,bi->kbo", params["W1"], states) + params["b1"]
    h = jax.nn.relu(h)
    h = jnp.einsum("kio,kbi->kbo", params["W2"], h) + params["b2"]
    h = jax.nn.relu(h)
    z_encs = jnp.einsum("kio,kbi->kbo", params["W3"], h) + params["b3"]
    z_encs = jnp.transpose(z_encs, (1, 0, 2))           # (B, K, out)
    t = jax.nn.relu(z_context @ params["Wt1"] + params["bt1"])
    t = jax.nn.relu(t @ params["Wt2"] + params["bt2"])
    logits = t @ params["Wt3"] + params["bt3"]
    alpha = jax.nn.softmax(logits, axis=-1)[..., None]  # (B, K, 1)
    z_enc = (z_encs * alpha).sum(axis=1) / alpha.sum(axis=1)
    return jnp.concatenate([z_context, z_enc], axis=1)


def make_params(key, *, K, state_dim, hidden_dims, out_dim, ctx_dim):
    h1, h2 = hidden_dims
    ks = jax.random.split(key, 12)
    scale = 0.1
    return {
        "W1": scale * jax.random.normal(ks[0], (K, state_dim, h1), jnp.float32),
        "b1": scale * jax.random.normal(ks[1], (K, 1, h1), jnp.float32),
        "W2": scale * jax.random.normal(ks[2], (K, h1, h2), jnp.float32),
        "b2": scale * jax.random.normal(ks[3], (K, 1, h2), jnp.float32),
        "W3": scale * jax.random.normal(ks[4], (K, h2, out_dim), jnp.float32),
        "b3": scale * jax.random.normal(ks[5], (K, 1, out_dim), jnp.float32),
        "Wt1": scale * jax.random.normal(ks[6], (ctx_dim, h1), jnp.float32),
        "bt1": scale * jax.random.normal(ks[7], (1, h1), jnp.float32),
        "Wt2": scale * jax.random.normal(ks[8], (h1, h2), jnp.float32),
        "bt2": scale * jax.random.normal(ks[9], (1, h2), jnp.float32),
        "Wt3": scale * jax.random.normal(ks[10], (h2, K), jnp.float32),
        "bt3": scale * jax.random.normal(ks[11], (1, K), jnp.float32),
    }


if __name__ == "__main__":
    # config (use_modified_care=False => ctx_dim == output_dim_mixtureEnc)
    B = 8
    K = 4               # num_encoders
    state_dim = 12
    num_tasks = 4
    hidden_dims = (32, 32)
    out_dim = 32        # output_dim_mixtureEnc
    ctx_dim = 32        # embedding_dim_contextEnc

    key = jax.random.PRNGKey(0)
    kp, kz, km, kt = jax.random.split(key, 4)
    params = make_params(kp, K=K, state_dim=state_dim, hidden_dims=hidden_dims,
                         out_dim=out_dim, ctx_dim=ctx_dim)

    z_context = jax.random.normal(kz, (B, ctx_dim), jnp.float32)
    states = jax.random.normal(km, (B, state_dim), jnp.float32)
    task_ids = jax.random.randint(kt, (B,), 0, num_tasks)
    one_hots = jax.nn.one_hot(task_ids, num_tasks, dtype=jnp.float32)
    mtobss = jnp.concatenate([states, one_hots], axis=1)   # (B, state_dim + num_tasks)

    ref = state_encoder_reference(z_context, mtobss, params, num_tasks=num_tasks)

    # f32 path: strict check against the f32 reference.
    packed32 = pack_params(params, num_tasks=num_tasks, compute_dtype=jnp.float32)
    fwd32 = jax.jit(functools.partial(state_encoder_forward, meta=packed32["meta"]))
    out32 = jax.block_until_ready(fwd32(z_context, mtobss, packed32["blob"]))
    assert out32.shape == (B, ctx_dim + out_dim)
    assert jnp.allclose(out32, ref, atol=2e-4, rtol=2e-4)

    # bf16 MXU-operand path (recommended on v6e/v7x): weights + matmul operands in
    # bf16, elementwise math and accumulation in f32; looser tolerance.
    packed16 = pack_params(params, num_tasks=num_tasks, compute_dtype=jnp.bfloat16)
    fwd16 = jax.jit(functools.partial(state_encoder_forward, meta=packed16["meta"]))
    out16 = jax.block_until_ready(fwd16(z_context, mtobss, packed16["blob"]))
    assert out16.shape == (B, ctx_dim + out_dim)
    assert jnp.allclose(out16, ref, atol=3e-2, rtol=3e-2)

    print("KERNEL_OK")
</pallas_src>

<mosaic_0001>
module attributes {stable_mosaic.version = 11 : i64} {
  func.func @_state_encoder_kernel(%arg0: i32, %arg1: memref<8x48xf32, #tpu.memory_space<vmem>>, %arg2: memref<528x160xf32, #tpu.memory_space<vmem>>, %arg3: memref<8x64xf32, #tpu.memory_space<vmem>>) attributes {dimension_semantics = [#tpu.dimension_semantics<parallel>], iteration_bounds = array<i64: 1>, scalar_prefetch = 0 : i64, scratch_operands = 0 : i64, tpu.core_type = #tpu.core_type<tc>, window_params = [{transform_indices = @transform_0, window_bounds = array<i64: 8, 48>}, {pipeline_mode = #tpu.pipeline_mode<synchronous>, transform_indices = @transform_1, window_bounds = array<i64: 528, 160>}, {transform_indices = @transform_2, window_bounds = array<i64: 8, 64>}]} {
    %c0 = arith.constant 0 : index
    %c0_0 = arith.constant 0 : index
    %0 = vector.load %arg1[%c0, %c0_0] : memref<8x48xf32, #tpu.memory_space<vmem>>, vector<8x48xf32>
    %c0_1 = arith.constant 0 : index
    %c0_2 = arith.constant 0 : index
    %1 = vector.load %arg2[%c0_1, %c0_2] : memref<528x160xf32, #tpu.memory_space<vmem>>, vector<48x160xf32>
    %c48 = arith.constant 48 : index
    %c0_3 = arith.constant 0 : index
    %2 = vector.load %arg2[%c48, %c0_3] : memref<528x160xf32, #tpu.memory_space<vmem>>, vector<160x160xf32>
    %c208 = arith.constant 208 : index
    %c0_4 = arith.constant 0 : index
    %3 = vector.load %arg2[%c208, %c0_4] : memref<528x160xf32, #tpu.memory_space<vmem>>, vector<160x160xf32>
    %c368 = arith.constant 368 : index
    %c0_5 = arith.constant 0 : index
    %4 = vector.load %arg2[%c368, %c0_5] : memref<528x160xf32, #tpu.memory_space<vmem>>, vector<8x160xf32>
    %5 = vector.extract_strided_slice %4 {offsets = [0, 0], sizes = [1, 160], strides = [1, 1]} : vector<8x160xf32> to vector<1x160xf32>
    %6 = vector.extract_strided_slice %4 {offsets = [1, 0], sizes = [1, 160], strides = [1, 1]} : vector<8x160xf32> to vector<1x160xf32>
    %7 = vector.extract_strided_slice %4 {offsets = [2, 0], sizes = [1, 160], strides = [1, 1]} : vector<8x160xf32> to vector<1x160xf32>
    %cst = arith.constant dense<0.000000e+00> : vector<8x160xf32>
    %8 = tpu.matmul %0, %1, %cst {dimension_numbers = #tpu.dot_dimension_numbers<[1], [0], [0], [1], [0, 0, 1, 1], [], []>} : vector<8x48xf32>, vector<48x160xf32>, vector<8x160xf32> -> vector<8x160xf32>
    %9 = vector.broadcast %5 : vector<1x160xf32> to vector<8x160xf32>
    %10 = arith.addf %8, %9 : vector<8x160xf32>
    %cst_6 = arith.constant 0.000000e+00 : f32
    %11 = vector.broadcast %cst_6 : f32 to vector<8x160xf32>
    %12 = arith.maximumf %10, %11 : vector<8x160xf32>
    %cst_7 = arith.constant dense<0.000000e+00> : vector<8x160xf32>
    %13 = tpu.matmul %12, %2, %cst_7 {dimension_numbers = #tpu.dot_dimension_numbers<[1], [0], [0], [1], [0, 0, 1, 1], [], []>} : vector<8x160xf32>, vector<160x160xf32>, vector<8x160xf32> -> vector<8x160xf32>
    %14 = vector.broadcast %6 : vector<1x160xf32> to vector<8x160xf32>
    %15 = arith.addf %13, %14 : vector<8x160xf32>
    %cst_8 = arith.constant 0.000000e+00 : f32
    %16 = vector.broadcast %cst_8 : f32 to vector<8x160xf32>
    %17 = arith.maximumf %15, %16 : vector<8x160xf32>
    %cst_9 = arith.constant dense<0.000000e+00> : vector<8x160xf32>
    %18 = tpu.matmul %17, %3, %cst_9 {dimension_numbers = #tpu.dot_dimension_numbers<[1], [0], [0], [1], [0, 0, 1, 1], [], []>} : vector<8x160xf32>, vector<160x160xf32>, vector<8x160xf32> -> vector<8x160xf32>
    %19 = vector.broadcast %7 : vector<1x160xf32> to vector<8x160xf32>
    %20 = arith.addf %18, %19 : vector<8x160xf32>
    %21 = vector.extract_strided_slice %20 {offsets = [0, 0], sizes = [8, 128], strides = [1, 1]} : vector<8x160xf32> to vector<8x128xf32>
    %22 = vector.extract_strided_slice %20 {offsets = [0, 128], sizes = [8, 4], strides = [1, 1]} : vector<8x160xf32> to vector<8x4xf32>
    %cst_10 = arith.constant dense<0xFF800000> : vector<8xf32>
    %23 = vector.multi_reduction <maximumf>, %22, %cst_10 [1] : vector<8x4xf32> to vector<8xf32>
    %24 = vector.shape_cast %23 : vector<8xf32> to vector<8x1xf32>
    %25 = vector.broadcast %24 : vector<8x1xf32> to vector<8x4xf32>
    %26 = arith.subf %22, %25 : vector<8x4xf32>
    %27 = math.exp %26 : vector<8x4xf32>
    %cst_11 = arith.constant dense<0.000000e+00> : vector<8xf32>
    %28 = vector.multi_reduction <add>, %27, %cst_11 [1] : vector<8x4xf32> to vector<8xf32>
    %29 = vector.shape_cast %28 : vector<8xf32> to vector<8x1xf32>
    %30 = vector.broadcast %29 : vector<8x1xf32> to vector<8x4xf32>
    %31 = arith.divf %27, %30 : vector<8x4xf32>
    %c384 = arith.constant 384 : index
    %c0_12 = arith.constant 0 : index
    %32 = vector.load %arg2[%c384, %c0_12] : memref<528x160xf32, #tpu.memory_space<vmem>>, vector<4x128xf32>
    %c400 = arith.constant 400 : index
    %c0_13 = arith.constant 0 : index
    %33 = vector.load %arg2[%c400, %c0_13] : memref<528x160xf32, #tpu.memory_space<vmem>>, vector<128x32xf32>
    %cst_14 = arith.constant dense<0.000000e+00> : vector<8x128xf32>
    %34 = tpu.matmul %31, %32, %cst_14 {dimension_numbers = #tpu.dot_dimension_numbers<[1], [0], [0], [1], [0, 0, 1, 1], [], []>} : vector<8x4xf32>, vector<4x128xf32>, vector<8x128xf32> -> vector<8x128xf32>
    %35 = arith.mulf %34, %21 : vector<8x128xf32>
    %cst_15 = arith.constant dense<0.000000e+00> : vector<8x32xf32>
    %36 = tpu.matmul %35, %33, %cst_15 {dimension_numbers = #tpu.dot_dimension_numbers<[1], [0], [0], [1], [0, 0, 1, 1], [], []>} : vector<8x128xf32>, vector<128x32xf32>, vector<8x32xf32> -> vector<8x32xf32>
    %37 = vector.extract_strided_slice %0 {offsets = [0, 0], sizes = [8, 32], strides = [1, 1]} : vector<8x48xf32> to vector<8x32xf32>
    %c0_16 = arith.constant 0 : index
    %c0_17 = arith.constant 0 : index
    %38 = vector.load %arg3[%c0_16, %c0_17] : memref<8x64xf32, #tpu.memory_space<vmem>>, vector<8x32xf32>
    tpu.vector_store %arg3[%c0_16, %c0_17], %37 {strides = array<i32>} : memref<8x64xf32, #tpu.memory_space<vmem>>, vector<8x32xf32>,
    %c0_18 = arith.constant 0 : index
    %c32 = arith.constant 32 : index
    %39 = vector.load %arg3[%c0_18, %c32] : memref<8x64xf32, #tpu.memory_space<vmem>>, vector<8x32xf32>
    tpu.vector_store %arg3[%c0_18, %c32], %36 {strides = array<i32>} : memref<8x64xf32, #tpu.memory_space<vmem>>, vector<8x32xf32>,
    return
  }
  func.func @transform_0(%arg0: i32) -> (i32, i32) {
    %c0_i32 = arith.constant 0 : i32
    %c0_i32_0 = arith.constant 0 : i32
    return %arg0, %c0_i32 : i32, i32
  }
  func.func @transform_1(%arg0: i32) -> (i32, i32) {
    %c0_i32 = arith.constant 0 : i32
    %c0_i32_0 = arith.constant 0 : i32
    %c0_i32_1 = arith.constant 0 : i32
    return %c0_i32, %c0_i32_0 : i32, i32
  }
  func.func @transform_2(%arg0: i32) -> (i32, i32) {
    %c0_i32 = arith.constant 0 : i32
    %c0_i32_0 = arith.constant 0 : i32
    return %arg0, %c0_i32 : i32, i32
  }
}

</mosaic_0001>

<bundles_post_ra>
// kernel: state_encoder_forward.1
= control target key start
LH: loop header
LB: loop body
LE: loop exit
PB: predicated region body
PF: predicated region fallthrough
CT: control target
= control target key end

     0   :  { %v770_v7 = vmov 0.0   ;;  %vm115_vm0 = vcmask 392192   ;;  %s1169_s0 = inlined_call_operand.vmem [shape: f32[8,48], index: 0, kind: input, shape index: {}]   ;;  %s1170_s1 = inlined_call_operand.vmem [shape: f32[528,160], index: 1, kind: input, shape index: {}]   ;;  %s1171_s2 = inlined_call_operand.hbm [shape: f32[8,64], index: 2, kind: output, shape index: {}]  }
   0x1   :  { %v14_v0 = vld [vmem:[%s1170_s1 + $0x8] sm:$0xff]  ;;  %v16_v1 = vld [vmem:[%s1170_s1 + $0x18] sm:$0xff]  ;;  %v13_v2 = vld [vmem:[%s1170_s1] sm:$0xff]  ;;  %183 = vmatprep.mubr.f32.mxu0 %v770_v7 }
   0x2   :  { %v621_v3 = vpack.c.bf16 %v16_v1, %v14_v0  ;;  %v15_v4 = vld [vmem:[%s1170_s1 + $0x10] sm:$0xff]  ;;  %v18_v5 = vld [vmem:[%s1170_s1 + $0x28] sm:$0xff]  ;;  %v20_v6 = vld [vmem:[%s1170_s1 + $0x38] sm:$0xff] }
   0x3   :  { %v623_v8 = vpack.c.bf16 %v15_v4, %v13_v2  ;;  %v625_v9 = vpack.c.bf16 %v20_v6, %v18_v5  ;;  %v17_v10 = vld [vmem:[%s1170_s1 + $0x20] sm:$0xff]  ;;  %v19_v11 = vld [vmem:[%s1170_s1 + $0x30] sm:$0xff]  ;;  %v22_v12 = vld [vmem:[%s1170_s1 + $0x48] sm:$0xff] }
   0x4   :  { %622 = vmatprep.subr.bf16.mxu0 %v621_v3  ;;  %v24_v13 = vld [vmem:[%s1170_s1 + $0x58] sm:$0xff]  ;;  %v21_v14 = vld [vmem:[%s1170_s1 + $0x40] sm:$0xff]  ;;  %v627_v15 = vpack.c.bf16 %v19_v11, %v17_v10  ;;  %v23_v16 = vld [vmem:[%s1170_s1 + $0x50] sm:$0xff] }
   0x5   :  { %624 = vmatpush1.bf16.msra.mxu0 %v623_v8  ;;  %v26_v17 = vld [vmem:[%s1170_s1 + $0x68] sm:$0xff]  ;;  %v28_v18 = vld [vmem:[%s1170_s1 + $0x78] sm:$0xff]  ;;  %v629_v19 = vpack.c.bf16 %v24_v13, %v22_v12  ;;  %v25_v21 = vld [vmem:[%s1170_s1 + $0x60] sm:$0xff]  ;;  %v631_v31 = vpack.c.bf16 %v23_v16, %v21_v14 }
   0x6   :  { %626 = vmatprep.subr.bf16.mxu0 %v625_v9  ;;  %v633_v20 = vpack.c.bf16 %v28_v18, %v26_v17  ;;  %v27_v22 = vld [vmem:[%s1170_s1 + $0x70] sm:$0xff]  ;;  %v30_v23 = vld [vmem:[%s1170_s1 + $0x88] sm:$0xff]  ;;  %v32_v25 = vld [vmem:[%s1170_s1 + $0x98] sm:$0xff] }
   0x7   :  { %v635_v24 = vpack.c.bf16 %v27_v22, %v25_v21  ;;  %v29_v26 = vld [vmem:[%s1170_s1 + $0x80] sm:$0xff]  ;;  %v31_v27 = vld [vmem:[%s1170_s1 + $0x90] sm:$0xff]  ;;  %v637_v28 = vpack.c.bf16 %v32_v25, %v30_v23  ;;  %v34_v29 = vld [vmem:[%s1170_s1 + $0xa8] sm:$0xff] }
   0x8   :  { %634 = vmatprep.subr.bf16.mxu1 %v633_v20  ;;  %v36_v30 = vld [vmem:[%s1170_s1 + $0xb8] sm:$0xff]  ;;  %v639_v32 = vpack.c.bf16 %v31_v27, %v29_v26  ;;  %v33_v34 = vld [vmem:[%s1170_s1 + $0xa0] sm:$0xff]  ;;  %v35_v35 = vld [vmem:[%s1170_s1 + $0xb0] sm:$0xff] }
   0x9   :  { %628 = vmatpush1.bf16.msra.mxu0 %v627_v15  ;;  %636 = vmatpush1.bf16.msra.mxu1 %v635_v24  ;;  %v641_v33 = vpack.c.bf16 %v36_v30, %v34_v29  ;;  %v38_v36 = vld [vmem:[%s1170_s1 + $0xc8] sm:$0xff]  ;;  %v40_v37 = vld [vmem:[%s1170_s1 + $0xd8] sm:$0xff]  ;;  %v872_v38 = vld [vmem:[%s1169_s0] sm:$0xff]  ;;  %v643_v39 = vpack.c.bf16 %v35_v35, %v33_v34 }
   0xa   :  { %630 = vmatprep.subr.bf16.mxu0 %v629_v19  ;;  %638 = vmatprep.subr.bf16.mxu1 %v637_v28  ;;  %v645_v40 = vpack.c.bf16 %v40_v37, %v38_v36  ;;  %v37_v41 = vld [vmem:[%s1170_s1 + $0xc0] sm:$0xff]  ;;  %v39_v42 = vld [vmem:[%s1170_s1 + $0xd0] sm:$0xff]  ;;  %v42_v43 = vld [vmem:[%s1170_s1 + $0xe8] sm:$0xff] }
   0xb   :  { %v44_v44 = vld [vmem:[%s1170_s1 + $0xf8] sm:$0xff]  ;;  %v647_v45 = vpack.c.bf16 %v39_v42, %v37_v41 }
   0xd   :  { %632 = vmatpush1.bf16.msra.mxu0 %v631_v31  ;;  %640 = vmatpush1.bf16.msra.mxu1 %v639_v32 }
   0xe   :  { %642 = vmatprep.subr.bf16.mxu1 %v641_v33 }
  0x10   :  { %557 = vmatmul.mubr.msk.f32.vlgmr.msra.gmra.mrb[0].mxu0 %vm115_vm0, %v872_v38 }
  0x11   :  { %644 = vmatpush1.bf16.msra.mxu1 %v643_v39 }
  0x12   :  { %7 = vsyncpa [#allocation3], 0  ;;  %646 = vmatprep.subr.bf16.mxu1 %v645_v40  ;;  %v649_v46 = vpack.c.bf16 %v44_v44, %v42_v43  ;;  %v41_v47 = vld [vmem:[%s1170_s1 + $0xe0] sm:$0xff]  ;;  %v43_v48 = vld [vmem:[%s1170_s1 + $0xf0] sm:$0xff]  ;;  %vm200_vm1 = vcmask 261120   ;;  %vm359_vm2 = vcmask 31744  }
  0x13   :  { %v46_v49 = vld [vmem:[%s1170_s1 + $0x108] sm:$0xff]  ;;  %v48_v50 = vld [vmem:[%s1170_s1 + $0x118] sm:$0xff]  ;;  %v651_v51 = vpack.c.bf16 %v43_v48, %v41_v47  ;;  %v45_v53 = vld [vmem:[%s1170_s1 + $0x100] sm:$0xff]  ;;  %536 = vst.msk [vmem:[#allocation2] sm:$0xff] %vm200_vm1, %v872_v38  ;;  %vm391_vm3 = vcmask 1043456   ;;  %vm771_vm4 = vmmov 0  }
  0x14   :  { %v653_v52 = vpack.c.bf16 %v48_v50, %v46_v49  ;;  %v47_v54 = vld [vmem:[%s1170_s1 + $0x110] sm:$0xff]  ;;  %v50_v55 = vld [vmem:[%s1170_s1 + $0x128] sm:$0xff]  ;;  %v52_v56 = vld [vmem:[%s1170_s1 + $0x138] sm:$0xff]  ;;  %s773_s3 = smov 32   ;;  %s774_s4 = smov [#allocation2]   ;;  %vm541_vm5 = vcmask 523520  }
  0x15   :  { %648 = vmatpush1.bf16.msra.mxu1 %v647_v45  ;;  %v655_v57 = vpack.c.bf16 %v47_v54, %v45_v53  ;;  %v657_v58 = vpack.c.bf16 %v52_v56, %v50_v55  ;;  %v49_v59 = vld [vmem:[%s1170_s1 + $0x120] sm:$0xff]  ;;  %v51_v60 = vld [vmem:[%s1170_s1 + $0x130] sm:$0xff]  ;;  %v54_v61 = vld [vmem:[%s1170_s1 + $0x148] sm:$0xff]  ;;  %s549_s5 = sshll.u32 %s774_s4, 4  ;;  %s550_s5 = int_to_ptr.vmem [resolvable:$true] %s549_s5 }
  0x16   :  { %650 = vmatprep.subr.bf16.mxu1 %v649_v46  ;;  %v56_v62 = vld [vmem:[%s1170_s1 + $0x158] sm:$0xff]  ;;  %v659_v63 = vpack.c.bf16 %v51_v60, %v49_v59  ;;  %v53_v1 = vld [vmem:[%s1170_s1 + $0x140] sm:$0xff]  ;;  %v55_v2 = vld [vmem:[%s1170_s1 + $0x150] sm:$0xff]  ;;  %p751_p1 = scmp.lt.s32.totalorder %s550_s5, %s550_s5 }
  0x17   :  { %v661_v0 = vpack.c.bf16 %v56_v62, %v54_v61  ;;  %v58_v3 = vld [vmem:[%s1170_s1 + $0x168] sm:$0xff]  ;;  %v60_v4 = vld [vmem:[%s1170_s1 + $0x178] sm:$0xff]  ;;  %v663_v5 = vpack.c.bf16 %v55_v2, %v53_v1  ;;  %v57_v8 = vld [vmem:[%s1170_s1 + $0x160] sm:$0xff] }
  0x18   :  { %v665_v6 = vpack.c.bf16 %v60_v4, %v58_v3  ;;  %v59_v9 = vld [vmem:[%s1170_s1 + $0x170] sm:$0xff]  ;;  %v62_v11 = vld [vmem:[%s1170_s1 + $0x188] sm:$0xff]  ;;  %v64_v12 = vld [vmem:[%s1170_s1 + $0x198] sm:$0xff]  ;;  %v107_v4 = vlaneseq }
  0x19   :  { %652 = vmatpush1.bf16.msra.mxu1 %v651_v51  ;;  %v667_v10 = vpack.c.bf16 %v59_v9, %v57_v8  ;;  %v669_v13 = vpack.c.bf16 %v64_v12, %v62_v11  ;;  %v61_v14 = vld [vmem:[%s1170_s1 + $0x180] sm:$0xff]  ;;  %v63_v15 = vld [vmem:[%s1170_s1 + $0x190] sm:$0xff]  ;;  %v66_v17 = vld [vmem:[%s1170_s1 + $0x1a8] sm:$0xff] }
  0x1a   :  { %654 = vmatprep.subr.bf16.mxu1 %v653_v52  ;;  %v671_v16 = vpack.c.bf16 %v63_v15, %v61_v14  ;;  %v68_v18 = vld [vmem:[%s1170_s1 + $0x1b8] sm:$0xff]  ;;  %v65_v19 = vld [vmem:[%s1170_s1 + $0x1a0] sm:$0xff]  ;;  %v67_v21 = vld [vmem:[%s1170_s1 + $0x1b0] sm:$0xff] }
  0x1b   :  { %v673_v20 = vpack.c.bf16 %v68_v18, %v66_v17  ;;  %v70_v22 = vld [vmem:[%s1170_s1 + $0x1c8] sm:$0xff]  ;;  %v72_v23 = vld [vmem:[%s1170_s1 + $0x1d8] sm:$0xff]  ;;  %v675_v24 = vpack.c.bf16 %v67_v21, %v65_v19  ;;  %v69_v26 = vld [vmem:[%s1170_s1 + $0x1c0] sm:$0xff] }
  0x1c   :  { %v677_v25 = vpack.c.bf16 %v72_v23, %v70_v22  ;;  %v71_v27 = vld [vmem:[%s1170_s1 + $0x1d0] sm:$0xff]  ;;  %v74_v28 = vld [vmem:[%s1170_s1 + $0x1e8] sm:$0xff]  ;;  %v76_v29 = vld [vmem:[%s1170_s1 + $0x1f8] sm:$0xff] }
  0x1d   :  { %656 = vmatpush1.bf16.msra.mxu1 %v655_v57  ;;  %674 = vmatprep.subr.bf16.mxu0 %v673_v20  ;;  %v679_v30 = vpack.c.bf16 %v71_v27, %v69_v26  ;;  %v681_v31 = vpack.c.bf16 %v76_v29, %v74_v28  ;;  %v73_v32 = vld [vmem:[%s1170_s1 + $0x1e0] sm:$0xff]  ;;  %v75_v33 = vld [vmem:[%s1170_s1 + $0x1f0] sm:$0xff]  ;;  %v78_v34 = vld [vmem:[%s1170_s1 + $0x208] sm:$0xff] }
  0x1e   :  { %658 = vmatprep.subr.bf16.mxu1 %v657_v58  ;;  %676 = vmatpush1.bf16.msra.mxu0 %v675_v24  ;;  %v80_v35 = vld [vmem:[%s1170_s1 + $0x218] sm:$0xff]  ;;  %v683_v36 = vpack.c.bf16 %v75_v33, %v73_v32  ;;  %v77_v38 = vld [vmem:[%s1170_s1 + $0x200] sm:$0xff]  ;;  %v79_v39 = vld [vmem:[%s1170_s1 + $0x210] sm:$0xff] }
  0x1f   :  { %678 = vmatprep.subr.bf16.mxu0 %v677_v25  ;;  %v685_v37 = vpack.c.bf16 %v80_v35, %v78_v34  ;;  %v82_v40 = vld [vmem:[%s1170_s1 + $0x228] sm:$0xff]  ;;  %v84_v41 = vld [vmem:[%s1170_s1 + $0x238] sm:$0xff]  ;;  %v687_v42 = vpack.c.bf16 %v79_v39, %v77_v38  ;;  %v81_v44 = vld [vmem:[%s1170_s1 + $0x220] sm:$0xff] }
  0x20   :  { %v689_v43 = vpack.c.bf16 %v84_v41, %v82_v40  ;;  %v83_v45 = vld [vmem:[%s1170_s1 + $0x230] sm:$0xff]  ;;  %v86_v46 = vld [vmem:[%s1170_s1 + $0x248] sm:$0xff]  ;;  %v88_v47 = vld [vmem:[%s1170_s1 + $0x258] sm:$0xff] }
  0x21   :  { %660 = vmatpush1.bf16.msra.mxu1 %v659_v63  ;;  %v691_v48 = vpack.c.bf16 %v83_v45, %v81_v44  ;;  %v693_v49 = vpack.c.bf16 %v88_v47, %v86_v46  ;;  %v85_v50 = vld [vmem:[%s1170_s1 + $0x240] sm:$0xff]  ;;  %v87_v51 = vld [vmem:[%s1170_s1 + $0x250] sm:$0xff]  ;;  %v90_v52 = vld [vmem:[%s1170_s1 + $0x268] sm:$0xff] }
  0x22   :  { %662 = vmatprep.subr.bf16.mxu1 %v661_v0  ;;  %680 = vmatpush1.bf16.msra.mxu0 %v679_v30  ;;  %v92_v53 = vld [vmem:[%s1170_s1 + $0x278] sm:$0xff]  ;;  %v695_v54 = vpack.c.bf16 %v87_v51, %v85_v50  ;;  %v89_v56 = vld [vmem:[%s1170_s1 + $0x260] sm:$0xff]  ;;  %v91_v57 = vld [vmem:[%s1170_s1 + $0x270] sm:$0xff]  ;;  %v772_v51 = vmov 0.0|0.0  }
  0x23   :  { %682 = vmatprep.subr.bf16.mxu0 %v681_v31  ;;  %v697_v55 = vpack.c.bf16 %v92_v53, %v90_v52  ;;  %v94_v58 = vld [vmem:[%s1170_s1 + $0x288] sm:$0xff]  ;;  %v96_v59 = vld [vmem:[%s1170_s1 + $0x298] sm:$0xff]  ;;  %v699_v60 = vpack.c.bf16 %v91_v57, %v89_v56  ;;  %v93_v62 = vld [vmem:[%s1170_s1 + $0x280] sm:$0xff] }
  0x24   :  { %v701_v61 = vpack.c.bf16 %v96_v59, %v94_v58  ;;  %v95_v63 = vld [vmem:[%s1170_s1 + $0x290] sm:$0xff]  ;;  %v98_v0 = vld [vmem:[%s1170_s1 + $0x2a8] sm:$0xff]  ;;  %v100_v1 = vld [vmem:[%s1170_s1 + $0x2b8] sm:$0xff] }
  0x25   :  { %664 = vmatpush1.bf16.msra.mxu1 %v663_v5  ;;  %v703_v2 = vpack.c.bf16 %v95_v63, %v93_v62  ;;  %v705_v3 = vpack.c.bf16 %v100_v1, %v98_v0  ;;  %v1057_v5 = vshrl.u32 %v107_v4, 7  ;;  %v1063_v8 = vld [vmem:[%s1170_s1 + $0x2e0] sm:$0xff]  ;;  %v106_v9 = vld [vmem:[%s1170_s1 + $0x2e8] sm:$0xff]  ;;  %v99_v19 = vld [vmem:[%s1170_s1 + $0x2b0] sm:$0xff] }
  0x26   :  { %666 = vmatprep.subr.bf16.mxu1 %v665_v6  ;;  %684 = vmatpush1.bf16.msra.mxu0 %v683_v36  ;;  %v97_v18 = vld [vmem:[%s1170_s1 + $0x2a0] sm:$0xff]  ;;  %v102_v21 = vld [vmem:[%s1170_s1 + $0x2c8] sm:$0xff]  ;;  %v104_v22 = vld [vmem:[%s1170_s1 + $0x2d8] sm:$0xff] }
  0x27   :  { %686 = vmatprep.subr.bf16.mxu0 %v685_v37  ;;  %v109_v6 = vsub.s32 0, %v1057_v5  ;;  %v707_v20 = vpack.c.bf16 %v99_v19, %v97_v18  ;;  %v709_v23 = vpack.c.bf16 %v104_v22, %v102_v21  ;;  %v101_v24 = vld [vmem:[%s1170_s1 + $0x2c0] sm:$0xff]  ;;  %v103_v25 = vld [vmem:[%s1170_s1 + $0x2d0] sm:$0xff]  ;;  %v194_v27 = vsub.s32 1, %v1057_v5 }
  0x28   :  { %v711_v26 = vpack.c.bf16 %v103_v25, %v101_v24  ;;  %v279_v36 = vsub.s32 2, %v1057_v5  ;;  %v371_v47 = vld [vmem:[%s1170_s1 + $0x300] sm:$0xf]  ;;  %v375_v53 = vld [vmem:[%s1170_s1 + $0x350] sm:$0xff] }
  0x29   :  { %668 = vmatpush1.bf16.msra.mxu1 %v667_v10  ;;  %v110_v10 = vrot.slane %v1063_v8, %v109_v6  ;;  %v114_v11 = vrot.slane %v106_v9, %v109_v6  ;;  %v195_v28 = vrot.slane %v1063_v8, %v194_v27  ;;  %v199_v29 = vrot.slane %v106_v9, %v194_v27  ;;  %v374_v50 = vld [vmem:[%s1170_s1 + $0x340] sm:$0xff]  ;;  %v377_v56 = vld [vmem:[%s1170_s1 + $0x370] sm:$0xff] }
  0x2a   :  { %670 = vmatprep.subr.bf16.mxu1 %v669_v13  ;;  %688 = vmatpush1.bf16.msra.mxu0 %v687_v42  ;;  %v284_v37 = vrot.slane %v106_v9, %v279_v36  ;;  %v378_v57 = vld [vmem:[%s1170_s1 + $0x380] sm:$0xff]  ;;  %v379_v58 = vld [vmem:[%s1170_s1 + $0x390] sm:$0xff] }
  0x2b   :  { %690 = vmatprep.subr.bf16.mxu0 %v689_v43  ;;  %v723_v59 = vpack.c.bf16 %v379_v58, %v378_v57  ;;  %v382_v63 = vld [vmem:[%s1170_s1 + $0x3c0] sm:$0xff]  ;;  %v383_v0 = vld [vmem:[%s1170_s1 + $0x3d0] sm:$0xff] }
  0x2c   :  { %v729_v1 = vpack.c.bf16 %v383_v0, %v382_v63 }
  0x2d   :  { %672 = vmatpush1.bf16.msra.mxu1 %v671_v16 }
  0x2e   :  { %692 = vmatpush1.bf16.msra.mxu0 %v691_v48  ;;  %v372_v48 = vld [vmem:[%s1170_s1 + $0x320] sm:$0xff]  ;;  %713 = vmatprep.subr.bf16.mxu1 %v772_v51 }
  0x2f   :  { %694 = vmatprep.subr.bf16.mxu0 %v693_v49  ;;  %v373_v49 = vld [vmem:[%s1170_s1 + $0x330] sm:$0xff] }
  0x30   :  { %v714_v52 = vpack.c.bf16 %v373_v49, %v372_v48 }
  0x32   :  { %696 = vmatpush1.bf16.msra.mxu0 %v695_v54  ;;  %v717_v54 = vpack.c.bf16 %v375_v53, %v374_v50 }
  0x33   :  { %698 = vmatprep.subr.bf16.mxu0 %v697_v55  ;;  %v376_v55 = vld [vmem:[%s1170_s1 + $0x360] sm:$0xff] }
  0x36   :  { %700 = vmatpush1.bf16.msra.mxu0 %v699_v60  ;;  %v380_v60 = vld [vmem:[%s1170_s1 + $0x3a0] sm:$0xff] }
  0x37   :  { %702 = vmatprep.subr.bf16.mxu0 %v701_v61  ;;  %v381_v61 = vld [vmem:[%s1170_s1 + $0x3b0] sm:$0xff] }
  0x38   :  { %v726_v62 = vpack.c.bf16 %v381_v61, %v380_v60 }
  0x3a   :  { %704 = vmatpush1.bf16.msra.mxu0 %v703_v2  ;;  %v384_v2 = vld [vmem:[%s1170_s1 + $0x3e0] sm:$0xff] }
  0x3b   :  { %706 = vmatprep.subr.bf16.mxu0 %v705_v3  ;;  %v385_v3 = vld [vmem:[%s1170_s1 + $0x3f0] sm:$0xff] }
  0x3c   :  { %v732_v4 = vpack.c.bf16 %v385_v3, %v384_v2 }
  0x3e   :  { %708 = vmatpush1.bf16.msra.mxu0 %v707_v20 }
  0x3f   :  { %710 = vmatprep.subr.bf16.mxu0 %v709_v23 }
  0x42   :  { %712 = vmatpush1.bf16.msra.mxu0 %v711_v26 }
  0x43   :  { %581 = vmatprep.subr.mxu0 %v770_v7 }
  0xe3   :  { %v185_v12 = vpop.f32.mrb[0].mxu0 }
  0xe4   :  { %v186_v13 = vadd.f32 %v185_v12, %v110_v10  ;;  %v187_v14 = vpop.f32.mrb[1].mxu0  ;;  %v387_v12 = vld [vmem:[%s1170_s1 + $0x410] sm:$0xff] }
  0xe5   :  { %v188_v15 = vadd.f32 %v187_v14, %v114_v11  ;;  %v386_v11 = vld [vmem:[%s1170_s1 + $0x400] sm:$0xff]  ;;  %v280_v14 = vrot.slane %v1063_v8, %v279_v36  ;;  %s746_s1 = scalar_lea.vmem %s550_s5, 128 }
  0xe6   :  { %v190_v17 = vmax.f32 %v186_v13, 0.0  ;;  %v735_v13 = vpack.c.bf16 %v387_v12, %v386_v11  ;;  %p747_p0 = scmp.ne.s32.totalorder %s550_s5, %s746_s1  ;;  %p752_p2 = scmp.lt.s32.totalorder %s746_s1, %s746_s1 }
  0xe7   :  { %v191_v16 = vmax.f32 %v188_v15, 0.0 }
  0xe8   :  { %p753_p3 = por %p752_p2, %p751_p1 }
  0xe9   :  { %558 = vmatprep.mubr.msk.f32.mxu1 %vm200_vm1, %v191_v16 }
  0xea   :  { %269 = vmatmul.mubr.f32.vlgmr.msra.gmra.mrb[0].mxu1 %v190_v17  ;;  %p754_p4 = pnand %p753_p3, %p747_p0 }
  0xeb   :  { %618 = vmatprep.mubr.msk.f32.mxu1 %vm771_vm4, %v770_v7  ;;  %715 = vmatpush3.bf16.msra.mxu1 %v714_v52 }
  0xec   :  { %716 = vmatprep.subr.bf16.mxu1 %v772_v51 }
  0xef   :  { %718 = vmatpush3.bf16.msra.mxu1 %v717_v54 }
  0xf0   :  { %719 = vmatprep.subr.bf16.mxu1 %v772_v51 }
 0x1bd   :  { %v270_v30 = vpop.f32.mrb[0].mxu1 }
 0x1be   :  { %v271_v31 = vadd.f32 %v270_v30, %v195_v28  ;;  %v272_v32 = vpop.f32.mrb[1].mxu1 }
 0x1bf   :  { %v273_v33 = vadd.f32 %v272_v32, %v199_v29 }
 0x1c0   :  { %v275_v35 = vmax.f32 %v271_v31, 0.0 }
 0x1c1   :  { %v276_v34 = vmax.f32 %v273_v33, 0.0 }
 0x1c3   :  { %559 = vmatprep.mubr.msk.f32.mxu0 %vm200_vm1, %v276_v34 }
 0x1c4   :  { %353 = vmatmul.mubr.f32.vlgmr.msra.gmra.mrb[2].mxu0 %v275_v35 }
 0x1c5   :  { %582 = vmatpush3.msk.msra.mxu0 %vm391_vm3, %v371_v47  ;;  %583 = vmatprep.mubr.msk.f32.mxu0 %vm771_vm4, %v770_v7  ;;  %v720_v7 = vpack.c.bf16 %v377_v56, %v376_v55 }
 0x1c7   :  { %721 = vmatpush3.bf16.msra.mxu1 %v720_v7 }
 0x1c8   :  { %722 = vmatprep.subr.bf16.mxu1 %v772_v51 }
 0x1cb   :  { %724 = vmatpush3.bf16.msra.mxu1 %v723_v59 }
 0x1cc   :  { %725 = vmatprep.subr.bf16.mxu1 %v772_v51 }
 0x1cf   :  { %727 = vmatpush3.bf16.msra.mxu1 %v726_v62 }
 0x1d0   :  { %728 = vmatprep.subr.bf16.mxu1 %v772_v51 }
 0x1d3   :  { %730 = vmatpush3.bf16.msra.mxu1 %v729_v1 }
 0x1d4   :  { %731 = vmatprep.subr.bf16.mxu1 %v772_v51 }
 0x1d7   :  { %733 = vmatpush3.bf16.msra.mxu1 %v732_v4 }
 0x1d8   :  { %734 = vmatprep.subr.bf16.mxu1 %v772_v51 }
 0x1db   :  { %736 = vmatpush3.bf16.msra.mxu1 %v735_v13 }
 0x297   :  { %v1095_v38 = vpop.f32.mrb[2].mxu0 }
 0x298   :  { %v356_v39 = vpop.f32.mrb[3].mxu0  ;;  %v355_v15 = vadd.f32 %v1095_v38, %v280_v14 }
 0x299   :  { %v357_v40 = vadd.f32 %v356_v39, %v284_v37 }
 0x29b   :  { %v360_v41 = vsel %vm359_vm2, %v357_v40, -inf }
 0x29c   :  { %361 = vmax.xlane.f32.xlu0 %v360_v41 }
 0x329   :  { %v362_v42 = vpop.xlane.xlu0 %361 }
 0x32a   :  { %v363_v43 = vsub.f32 %v357_v40, %v362_v42 }
 0x32c   :  { %v364_v44 = vmul.f32 1.442695, %v363_v43 }
 0x32e   :  { %742 = vpow2.f32 %v364_v44 }
 0x338   :  { %v743_v45 = vpop.eup %742 }
 0x339   :  { %v366_v46 = vsel %vm359_vm2, %v743_v45, 0.0 }
 0x33a   :  { %367 = vadd.xlane.f32.xlu0 %v366_v46 }
 0x3c7   :  { %v368_v6 = vpop.xlane.xlu0 %367 }
 0x3c8   :  { %744 = vrcp.f32 %v368_v6 }
 0x3d2   :  { %v745_v9 = vpop.eup %744 }
 0x3d3   :  { %v370_v10 = vmul.f32 %v745_v9, %v743_v45 }
 0x3d5   :  { %584 = vmatmul.mubr.msk.f32.vlgmr.msra.gmra.mrb[4].mxu0 %vm359_vm2, %v370_v10 }
 0x4a8   :  { %v461_v16 = vpop.f32.mrb[4].mxu0 }
 0x4a9   :  { %v465_v17 = vmul.f32 %v461_v16, %v355_v15  ;;  %v585_v18 = vpop.f32.mrb[5].mxu0 }
 0x4ab   :  { %619 = vmatmul.mubr.f32.vlgmr.msra.gmra.mrb[2].mxu1 %v465_v17 }
 0x57e   :  { %v532_v19 = vpop.f32.mrb[2].mxu1 }
 0x57f   :  { %538 = vrot.lane.b32.xlu1 %v532_v19, %s773_s3  ;;  %v620_v20 = vpop.f32.mrb[3].mxu1 }
 0x5f1   :  { %v539_v21 = vpop.permute.xlu1 %538 }
 0x5f2   :  { %542 = vst.msk [vmem:[#allocation2] sm:$0xff] %vm541_vm5, %v539_v21 }
 0x5f3   :  { %757 = shalt.err (!%p754_p4)
}
 0x5f4   :  { %s758_s8 = scalar_lea.hbm %s1171_s2, 128 }
 0x5f5   :  { %p759_p5 = scmp.ne.s32.totalorder %s1171_s2, %s758_s8  ;;  %p762_p6 = scmp.lt.u32.totalorder %s758_s8, %s1171_s2 }
 0x5f7   :  { %p764_p7 = pnand %p762_p6, %p759_p5 }
 0x5f9   :  { %767 = shalt.err (!%p764_p7)
}
 0x5fa   :  { %552 = dma.vmem_to_hbm [thread:$0]  %s550_s5, 128, %s1171_s2, [#allocation3]  }
 0x5fb   :  { %768 = dma.done.wait [#allocation3], 128  }
 0x5fc   :  { %769 = vsyncadd [#allocation3], 4294967168 }
 0x5fd   :  { %556 = vsyncpa [#allocation3], 1 }

</bundles_post_ra>
